<compile_context>
chip_gen: v7x
topology: tpu7x:2x2x1
jax: 0.10.0
libtpu: 0.0.40
codegen_flags: <defaults>
</compile_context>

<pallas_src>
import jax
import jax.numpy as jnp
from jax import lax
from jax.experimental import pallas as pl
from jax.experimental.pallas import tpu as pltpu

DROP_P = 0.4
KEEP_SCALE = 1.0 / (1.0 - DROP_P)


def autoencoder_kernel(x_ref, w_ref, u_ref, enc_ref, rec_ref):
    # x: (TB, inp)  w: (out, inp)  u: (TB, out) uniforms in [0, 1)
    x = x_ref[...]
    w = w_ref[...]

    # encoded_pre = x @ W.T  -> (TB, out); contraction expressed directly so W
    # is consumed in its native layout (no transpose / VMEM copy).
    enc = lax.dot_general(
        x, w,
        dimension_numbers=(((1,), (1,)), ((), ())),
        preferred_element_type=jnp.float32,
    )

    # Dropout(p=0.4), inverted scaling: single compare + select + mul on the VPU.
    keep = u_ref[...] >= DROP_P
    enc_dropped = enc * jnp.where(keep, KEEP_SCALE, 0.0)

    enc_ref[...] = enc_dropped.astype(enc_ref.dtype)

    # reconstructed = encoded @ W  -> (TB, inp); W again in native layout.
    rec_ref[...] = jnp.dot(
        enc_dropped, w, preferred_element_type=jnp.float32
    ).astype(rec_ref.dtype)


def autoencoder_forward(x, w, uniforms):
    """x: (B, inp) f32, w: (out, inp) f32, uniforms: (B, out) f32 in [0,1).

    Returns (encoded, reconstructed) with the same semantics as the PyTorch
    forward in training mode.
    """
    B, inp = x.shape
    out = w.shape[0]
    assert w.shape == (out, inp)
    assert uniforms.shape == (B, out)

    # Batch tile: 128 rows fills the MXU sublane dimension; fall back to a
    # single tile for small / ragged batches.
    TB = 128 if (B % 128 == 0) else B
    grid = (B // TB,)

    cost = pl.CostEstimate(
        flops=2 * B * inp * out * 2,        # two (B, inp) x (inp, out)-class matmuls
        transcendentals=0,
        bytes_accessed=4 * (B * inp        # x in
                            + out * inp    # W in
                            + B * out      # uniforms in
                            + B * out      # encoded out
                            + B * inp),    # reconstructed out
    )

    return pl.pallas_call(
        autoencoder_kernel,
        out_shape=(jax.ShapeDtypeStruct((B, out), jnp.float32),
                   jax.ShapeDtypeStruct((B, inp), jnp.float32)),
        grid_spec=pltpu.PrefetchScalarGridSpec(
            num_scalar_prefetch=0,
            grid=grid,
            in_specs=[
                pl.BlockSpec((TB, inp), lambda i: (i, 0)),   # x tile (pipelined)
                pl.BlockSpec((out, inp), lambda i: (0, 0)),  # W resident across grid
                pl.BlockSpec((TB, out), lambda i: (i, 0)),   # dropout uniforms tile
            ],
            out_specs=[
                pl.BlockSpec((TB, out), lambda i: (i, 0)),   # encoded tile
                pl.BlockSpec((TB, inp), lambda i: (i, 0)),   # reconstructed tile
            ],
        ),
        compiler_params=pltpu.CompilerParams(
            dimension_semantics=("parallel",),   # batch tiles independent -> v7x 2-TC
            vmem_limit_bytes=64 << 20,           # headroom for a resident W at larger shapes
        ),
        cost_estimate=cost,
    )(x, w, uniforms)


if __name__ == "__main__":
    # Small but lane-dense / MXU-shaped demo: Linear(128 -> 128), batch 256
    # (two 128-row grid tiles, so the batch pipeline is actually exercised).
    B, INP, OUT = 256, 128, 128

    key = jax.random.PRNGKey(0)
    kx, kw, kd = jax.random.split(key, 3)
    x = jax.random.normal(kx, (B, INP), dtype=jnp.float32)
    # torch.nn.init.normal_(weight): standard normal, shape (out, inp)
    w = jax.random.normal(kw, (OUT, INP), dtype=jnp.float32)
    # Dropout randomness generated host-side (HW PRNG has no interpret lowering).
    uniforms = jax.random.uniform(kd, (B, OUT), dtype=jnp.float32)

    encoded, reconstructed = autoencoder_forward(x, w, uniforms)
    jax.block_until_ready((encoded, reconstructed))

    # Reference (same mask, high-precision matmuls).
    enc_pre = jnp.dot(x, w.T, precision=lax.Precision.HIGHEST)
    keep = uniforms >= DROP_P
    enc_ref = jnp.where(keep, enc_pre * KEEP_SCALE, 0.0)
    rec_ref = jnp.dot(enc_ref, w, precision=lax.Precision.HIGHEST)

    assert encoded.shape == (B, OUT)
    assert reconstructed.shape == (B, INP)
    assert jnp.allclose(encoded, enc_ref, rtol=1e-3, atol=1e-2)
    assert jnp.allclose(reconstructed, rec_ref, rtol=1e-3, atol=5e-2)

    print("KERNEL_OK")
</pallas_src>

<mosaic_0001>
module attributes {stable_mosaic.version = 11 : i64} {
  func.func @autoencoder_kernel(%arg0: i32, %arg1: memref<128x128xf32, #tpu.memory_space<vmem>>, %arg2: memref<128x128xf32, #tpu.memory_space<vmem>>, %arg3: memref<128x128xf32, #tpu.memory_space<vmem>>, %arg4: memref<128x128xf32, #tpu.memory_space<vmem>>, %arg5: memref<128x128xf32, #tpu.memory_space<vmem>>) attributes {dimension_semantics = [#tpu.dimension_semantics<parallel>], iteration_bounds = array<i64: 2>, scalar_prefetch = 0 : i64, scratch_operands = 0 : i64, tpu.core_type = #tpu.core_type<tc>, window_params = [{transform_indices = @transform_0, window_bounds = array<i64: 128, 128>}, {pipeline_mode = #tpu.pipeline_mode<synchronous>, transform_indices = @transform_1, window_bounds = array<i64: 128, 128>}, {transform_indices = @transform_2, window_bounds = array<i64: 128, 128>}, {transform_indices = @transform_3, window_bounds = array<i64: 128, 128>}, {transform_indices = @transform_4, window_bounds = array<i64: 128, 128>}]} {
    %c0 = arith.constant 0 : index
    %c0_0 = arith.constant 0 : index
    %0 = vector.load %arg1[%c0, %c0_0] : memref<128x128xf32, #tpu.memory_space<vmem>>, vector<128x128xf32>
    %c0_1 = arith.constant 0 : index
    %c0_2 = arith.constant 0 : index
    %1 = vector.load %arg2[%c0_1, %c0_2] : memref<128x128xf32, #tpu.memory_space<vmem>>, vector<128x128xf32>
    %cst = arith.constant dense<0.000000e+00> : vector<128x128xf32>
    %2 = tpu.matmul %0, %1, %cst {dimension_numbers = #tpu.dot_dimension_numbers<[1], [1], [0], [0], [0, 0, 1, 0], [], []>} : vector<128x128xf32>, vector<128x128xf32>, vector<128x128xf32> -> vector<128x128xf32>
    %c0_3 = arith.constant 0 : index
    %c0_4 = arith.constant 0 : index
    %3 = vector.load %arg3[%c0_3, %c0_4] : memref<128x128xf32, #tpu.memory_space<vmem>>, vector<128x128xf32>
    %cst_5 = arith.constant 4.000000e-01 : f32
    %4 = vector.broadcast %cst_5 : f32 to vector<128x128xf32>
    %5 = arith.cmpf oge, %3, %4 : vector<128x128xf32>
    %cst_6 = arith.constant 1.66666663 : f32
    %cst_7 = arith.constant 0.000000e+00 : f32
    %6 = vector.broadcast %cst_6 : f32 to vector<128x128xf32>
    %7 = vector.broadcast %cst_7 : f32 to vector<128x128xf32>
    %8 = arith.select %5, %6, %7 : vector<128x128xi1>, vector<128x128xf32>
    %9 = arith.mulf %2, %8 : vector<128x128xf32>
    %c0_8 = arith.constant 0 : index
    %c0_9 = arith.constant 0 : index
    %10 = vector.load %arg4[%c0_8, %c0_9] : memref<128x128xf32, #tpu.memory_space<vmem>>, vector<128x128xf32>
    tpu.vector_store %arg4[%c0_8, %c0_9], %9 {strides = array<i32>} : memref<128x128xf32, #tpu.memory_space<vmem>>, vector<128x128xf32>,
    %cst_10 = arith.constant dense<0.000000e+00> : vector<128x128xf32>
    %11 = tpu.matmul %9, %1, %cst_10 {dimension_numbers = #tpu.dot_dimension_numbers<[1], [0], [0], [1], [0, 0, 1, 1], [], []>} : vector<128x128xf32>, vector<128x128xf32>, vector<128x128xf32> -> vector<128x128xf32>
    %c0_11 = arith.constant 0 : index
    %c0_12 = arith.constant 0 : index
    %12 = vector.load %arg5[%c0_11, %c0_12] : memref<128x128xf32, #tpu.memory_space<vmem>>, vector<128x128xf32>
    tpu.vector_store %arg5[%c0_11, %c0_12], %11 {strides = array<i32>} : memref<128x128xf32, #tpu.memory_space<vmem>>, vector<128x128xf32>,
    return
  }
  func.func @transform_0(%arg0: i32) -> (i32, i32) {
    %c0_i32 = arith.constant 0 : i32
    %c0_i32_0 = arith.constant 0 : i32
    return %arg0, %c0_i32 : i32, i32
  }
  func.func @transform_1(%arg0: i32) -> (i32, i32) {
    %c0_i32 = arith.constant 0 : i32
    %c0_i32_0 = arith.constant 0 : i32
    %c0_i32_1 = arith.constant 0 : i32
    return %c0_i32, %c0_i32_0 : i32, i32
  }
  func.func @transform_2(%arg0: i32) -> (i32, i32) {
    %c0_i32 = arith.constant 0 : i32
    %c0_i32_0 = arith.constant 0 : i32
    return %arg0, %c0_i32 : i32, i32
  }
  func.func @transform_3(%arg0: i32) -> (i32, i32) {
    %c0_i32 = arith.constant 0 : i32
    %c0_i32_0 = arith.constant 0 : i32
    return %arg0, %c0_i32 : i32, i32
  }
  func.func @transform_4(%arg0: i32) -> (i32, i32) {
    %c0_i32 = arith.constant 0 : i32
    %c0_i32_0 = arith.constant 0 : i32
    return %arg0, %c0_i32 : i32, i32
  }
}

</mosaic_0001>

<bundles_post_ra>
// kernel: tpu_custom_call.1
= control target key start
LH: loop header
LB: loop body
LE: loop exit
PB: predicated region body
PF: predicated region fallthrough
CT: control target
= control target key end

     0   :  { %10 = vsyncpa [#allocation3], 0  ;;  %s1836_s0 = inlined_call_operand.hbm [shape: f32[256,128], index: 0, kind: input, shape index: {}]   ;;  %s1837_s1 = inlined_call_operand.hbm [shape: f32[128,128], index: 1, kind: input, shape index: {}]   ;;  %s1838_s2 = inlined_call_operand.hbm [shape: f32[256,128], index: 2, kind: input, shape index: {}]   ;;  %s1839_s3 = inlined_call_operand.hbm [shape: f32[256,128], index: 3, kind: output, shape index: {0}]   ;;  %s1840_s4 = inlined_call_operand.hbm [shape: f32[256,128], index: 4, kind: output, shape index: {1}]  }
   0x1   :  { %12 = vsyncpa [#allocation3 + $0x1], 0 }
   0x2   :  { %13 = vsyncpa [#allocation6], 0 }
   0x3   :  { %14 = vsyncpa [#allocation4], 0 }
   0x4   :  { %16 = vsyncpa [#allocation4 + $0x1], 0 }
   0x5   :  { %17 = vsyncpa [#allocation10], 0 }
   0x6   :  { %19 = vsyncpa [#allocation10 + $0x1], 0  ;;  %s1442_s15 = smov 0   ;;  %s1444_s16 = smov 0  }
   0x7   :  { %s1446_s17 = smov 0   ;;  %s1448_s18 = smov 0  }
   0x8 LB: > { %s1463_s19 = sadd.s32 1, %s1405_s18   ;;  %s32_s20 = sadd.s32 1, %s1401_s17  ;;  %s1405_s18 = sphi %s1448_s18, %s1863_s18   ;;  %s1401_s17 = sphi %s1446_s17, %s1862_s17   ;;  %s1397_s16 = sphi %s1444_s16, %s1861_s16   ;;  %s1393_s15 = sphi %s1442_s15, %s1860_s15  }
   0x9   : > { %s29_s21 = ssub.s32 %s1405_s18, %s1463_s19  ;;  %p39_p0 = scmp.ne.s32.totalorder %s1401_s17, %s1397_s16 }
   0xa   : > { %p30_p1 = scmp.eq.s32.totalorder %s29_s21, 0  ;;  %p40_p2 = scmp.eq.s32.totalorder %s1405_s18, 0 }
   0xb   : > { %p1170_p5 = scmp.lt.s32.totalorder %s1405_s18, 2  ;;  %s181_s23 = sand.u32 1, %s1405_s18  }
   0xc   : > { %s1472_s22 = scalar_select %p30_p1, %s1401_s17, %s32_s20  }
   0xd   : > { %p41_p3 = por %p40_p2, %p39_p0  ;;  %s183_s24 = sand.u32 1, %s1401_s17  }
   0xe   : > { %s1481_s25 = sshll.u32 %s183_s24, 7  ;;  %s895_s26 = sshll.u32 %s1405_s18, 11 }
   0xf   : > { %s1489_s29 = scalar_lea.hbm %s1836_s0, %s895_s26  ;;  %s185_s30 = scalar_lea.vmem [#allocation2], %s1481_s25 }
  0x10   : > { %s192_s5 = sshll.u32 %s185_s30, 4  ;;  %p1492_p6 = pnand %p1170_p5, %p41_p3  ;;  %s1496_s5 = int_to_ptr.vmem [resolvable:$true] %s192_s5 }
  0x11   : > { %s1498_s7 = scalar_lea.sflag [#allocation3], %s181_s23  ;;  %s1211_s8 = scalar_lea.hbm %s1489_s29, 2048 }
  0x12   : > { %p1212_p7 = scmp.ne.s32.totalorder %s1489_s29, %s1211_s8  ;;  %p1213_p8 = pneg %p1492_p6 }
  0x13   : > { %s1216_s11 = scalar_lea.hbm %s1836_s0, 4096  ;;  %p1217_p11 = scmp.lt.u32.totalorder %s1489_s29, %s1836_s0 }
  0x14   : > { %p1214_p9 = pnand %p1213_p8, %p1212_p7  ;;  %p1218_p12 = scmp.lt.u32.totalorder %s1216_s11, %s1211_s8 }
  0x15   : > { %p1220_p1 = scmp.lt.u32.totalorder %s1211_s8, %s1489_s29 }
  0x16   : > { %p1215_p10 = pneg %p1214_p9  ;;  %p1219_p13 = por %p1218_p12, %p1217_p11 }
  0x18   : > { %p1221_p2 = por %p1220_p1, %p1219_p13 }
  0x1a   : > { %p1222_p3 = pnand %p1221_p2, %p1215_p10 }
  0x1c   : > { %1225 = shalt.err (!%p1222_p3)
}
  0x1d   : > { %s1226_s14 = scalar_lea.vmem %s1496_s5, 2048  ;;  %s1407_s20 = smov [#allocation2]  }
  0x1e   : > { %p1227_p5 = scmp.ne.s32.totalorder %s1496_s5, %s1226_s14  ;;  %s1231_s21 = sshll.u32 %s1407_s20, 4  ;;  %s1232_s21 = int_to_ptr.vmem [resolvable:$false] %s1231_s21 }
  0x1f   : > { %s1233_s23 = scalar_lea.vmem %s1232_s21, 4096  ;;  %p1234_p4 = scmp.lt.s32.totalorder %s1496_s5, %s1232_s21 }
  0x20   : > { %p1229_p7 = pnand %p1227_p5, %p1213_p8  ;;  %p1235_p11 = scmp.lt.s32.totalorder %s1233_s23, %s1226_s14 }
  0x22   : > { %p1230_p9 = pneg %p1229_p7  ;;  %p1236_p12 = por %p1235_p11, %p1234_p4 }
  0x24   : > { %p1237_p13 = pnand %p1236_p12, %p1230_p9 }
  0x26   : > { %1240 = shalt.err (!%p1237_p13)
}
  0x27   : > { %s1408_s24 = smov 128   ;;  %s1409_s27 = smov 8  }
  0x28   : > { %1158 = dma.hbm_to_vmem [thread:$0]  (!%p1492_p6), %s1489_s29, 2048, %s1496_s5, %s1498_s7, %s1408_s24, %s1408_s24, %s1409_s27  }
  0x29   : > { %s206_s28 = scalar_lea.vmem [#allocation7], %s1481_s25  ;;  %s1531_s8 = sadd.s32 4294967295, %s1405_s18  }
  0x2a   : > { %s213_s30 = sshll.u32 %s206_s28, 4  ;;  %s871_s9 = sadd.s32 4294967294, %s1405_s18   ;;  %s1564_s30 = int_to_ptr.vmem [resolvable:$true] %s213_s30 }
  0x2b   : > { %p45_p4 = scmp.ne.s32.totalorder %s1397_s16, %s1393_s15  ;;  %p1841_p10 = scmp.eq.s32.totalorder %s1531_s8, 0 }
  0x2c   : > { %p116_p1 = scmp.eq.s32.totalorder %s1531_s8, 1  ;;  %p122_p2 = scmp.eq.s32.totalorder %s871_s9, 1 }
  0x2d   : > { %p1540_p3 = por %p1841_p10, %p45_p4  ;;  %p872_p5 = scmp.ge.s32.totalorder %s1405_s18, 1 }
  0x2e   : > { %p1548_p7 = por %p116_p1, %p39_p0  ;;  %p1552_p9 = por %p122_p2, %p45_p4 }
  0x2f   : > { %s1846_s10 = scalar_select %p1540_p3, 1, 0 }
  0x30   : > { %s1847_s25 = scalar_select %p1548_p7, 1, 0 }
  0x31   : > { %s1848_s29 = scalar_select %p1552_p9, 1, 0 }
  0x32   : > { %p155_p11 = scmp.lt.s32.totalorder %s1405_s18, 3  ;;  %s1562_s12 = scalar_lea.hbm %s1838_s2, %s895_s26 }
  0x33   : > { %s1410_s14 = smov [#allocation5]   ;;  %s1241_s21 = scalar_lea.hbm %s1562_s12, 2048 }
  0x34   : > { %p1566_p0 = pnand %p872_p5, %p155_p11  ;;  %s1570_s20 = sshll.u32 %s1410_s14, 4  ;;  %s168_s20 = int_to_ptr.vmem [resolvable:$true] %s1570_s20 }
  0x35   : > { %p1242_p13 = scmp.ne.s32.totalorder %s1562_s12, %s1241_s21  ;;  %s1246_s28 = scalar_lea.hbm %s1838_s2, 4096 }
  0x36   : > { %s1849_s13 = scalar_select %p1566_p0, 1, 0 }
  0x37   : > { %p1244_p4 = pnand %p1242_p13, %p1213_p8  ;;  %p1247_p2 = scmp.lt.u32.totalorder %s1562_s12, %s1838_s2 }
  0x38   : > { %p1248_p5 = scmp.lt.u32.totalorder %s1246_s28, %s1241_s21  ;;  %p1250_p10 = scmp.lt.u32.totalorder %s1241_s21, %s1562_s12 }
  0x39   : > { %p1245_p1 = pneg %p1244_p4 }
  0x3a   : > { %p1249_p11 = por %p1248_p5, %p1247_p2 }
  0x3c   : > { %p1251_p9 = por %p1250_p10, %p1249_p11 }
  0x3e   : > { %p1252_p7 = pnand %p1251_p9, %p1245_p1 }
  0x40   : > { %1255 = shalt.err (!%p1252_p7)
}
  0x41   : > { %s1256_s11 = scalar_lea.vmem %s1564_s30, 2048  ;;  %s1411_s14 = smov [#allocation7]  }
  0x42   : > { %p1257_p13 = scmp.ne.s32.totalorder %s1564_s30, %s1256_s11  ;;  %s1261_s26 = sshll.u32 %s1411_s14, 4  ;;  %s1262_s26 = int_to_ptr.vmem [resolvable:$false] %s1261_s26 }
  0x43   : > { %s1263_s23 = scalar_lea.vmem %s1262_s26, 4096  ;;  %p1264_p3 = scmp.lt.s32.totalorder %s1564_s30, %s1262_s26 }
  0x44   : > { %p1259_p4 = pnand %p1257_p13, %p1213_p8  ;;  %p1265_p2 = scmp.lt.s32.totalorder %s1263_s23, %s1256_s11 }
  0x46   : > { %p1260_p12 = pneg %p1259_p4  ;;  %p1266_p5 = por %p1265_p2, %p1264_p3 }
  0x48   : > { %p1267_p10 = pnand %p1266_p5, %p1260_p12 }
  0x4a   : > { %1270 = shalt.err (!%p1267_p10)
}
  0x4b   : > { %1161 = dma.hbm_to_vmem [thread:$0]  (!%p1492_p6), %s1562_s12, 2048, %s1564_s30, %s1498_s7, %s1408_s24, %s1408_s24, %s1409_s27  }
  0x4c   : > { %p1850_p8 = scmp.eq.s32.totalorder %s1531_s8, 0  ;;  %p1851_p7 = pneg %p1566_p0 }
  0x4d   : > { %s1271_s9 = scalar_lea.hbm %s1837_s1, 2048 }
  0x4e   : > { %p1607_p9 = pnand %p1851_p7, %p1850_p8  ;;  %p1272_p3 = scmp.ne.s32.totalorder %s1837_s1, %s1271_s9 }
  0x4f   : > { %p1278_p11 = scmp.lt.u32.totalorder %s1271_s9, %s1837_s1 }
  0x50   : > { %p1273_p12 = pneg %p1607_p9 }
  0x52   : > { %p1274_p6 = pnand %p1273_p12, %p1272_p3 }
  0x54   : > { %p1275_p1 = pneg %p1274_p6 }
  0x56   : > { %p1280_p13 = pnand %p1278_p11, %p1275_p1 }
  0x58   : > { %1283 = shalt.err (!%p1280_p13)
}
  0x59   : > { %s1284_s12 = scalar_lea.vmem %s168_s20, 2048  ;;  %p1292_p10 = scmp.lt.s32.totalorder %s168_s20, %s168_s20 }
  0x5a   : > { %p1285_p4 = scmp.ne.s32.totalorder %s168_s20, %s1284_s12  ;;  %p1293_p8 = scmp.lt.s32.totalorder %s1284_s12, %s1284_s12 }
  0x5c   : > { %p1287_p2 = pnand %p1285_p4, %p1273_p12  ;;  %p1294_p7 = por %p1293_p8, %p1292_p10 }
  0x5e   : > { %p1288_p5 = pneg %p1287_p2 }
  0x60   : > { %p1295_p0 = pnand %p1294_p7, %p1288_p5 }
  0x62   : > { %1298 = shalt.err (!%p1295_p0)
}
  0x63   : > { %1154 = dma.hbm_to_vmem [thread:$0]  (!%p1607_p9), %s1837_s1, 2048, %s168_s20, [#allocation6], %s1408_s24, %s1408_s24, %s1409_s27  }
  0x64   : > { %p1853_p3 = scmp.ne.s32.totalorder %s1849_s13, 0 }
  0x65   : > { %s227_s23 = sand.u32 (!%p1853_p3), 1, %s1531_s8   ;;  %s1634_s28 = sand.u32 (!%p1853_p3), 1, %s1397_s16  }
  0x66   : > { %225 = sbr.rel (%p1853_p3) target bundleno = 654 (0x28e), region = 32  ;;  %s1637_s6 = sshll.u32 (!%p1853_p3), %s1634_s28, 7 }
  0x67   : > { %s228_s21 = scalar_lea.sflag (!%p1853_p3), [#allocation3], %s227_s23  ;;  %s1640_s9 = scalar_lea.vmem (!%p1853_p3), [#allocation2], %s1637_s6 }
  0x68   : > { %p1854_p0 = scmp.ne.s32.totalorder (!%p1853_p3), %s1846_s10, 0 }
  0x6d   : > { %1372 = dma.done.wait (%p1854_p0), %s228_s21, 2048  }
  0x6e   : > { %1374 = vsyncadd (%p1854_p0), %s228_s21, 4294965248  ;;  %p1855_p9 = scmp.eq.s32.totalorder %s1531_s8, 0 }
  0x70   : > { %1376 = dma.done.wait (%p1855_p9), [#allocation6], 2048   ;;  %p1856_p12 = pmov %p1855_p9 }
  0x71   : > { %s1651_s24 = scalar_lea.vmem [#allocation7], %s1637_s6 }
  0x72   : > { %1378 = vsyncadd (%p1856_p12), [#allocation6], 4294965248 }
  0x73   : > { %1380 = dma.done.wait (%p1854_p0), %s228_s21, 2048  }
  0x74   : > { %1382 = vsyncadd (%p1854_p0), %s228_s21, 4294965248  ;;  %v299_v0 = vld [vmem:[#allocation5] sm:$0xff]  ;;  %v300_v1 = vld [vmem:[#allocation5 + $0x8] sm:$0xff]  ;;  %v1412_v44 = vmov 0.0   ;;  %s1683_s27 = scalar_lea.vmem [#allocation8], %s1637_s6  ;;  %s897_s10 = sshll.u32 %s1531_s8, 11 }
  0x75   : > { %v301_v2 = vld [vmem:[#allocation5 + $0x10] sm:$0xff]  ;;  %v1075_v3 = vpack.c.bf16 %v300_v1, %v299_v0  ;;  %v302_v4 = vld [vmem:[#allocation5 + $0x18] sm:$0xff]  ;;  %v303_v6 = vld [vmem:[#allocation5 + $0x20] sm:$0xff]  ;;  %s720_s13 = sshll.u32 %s1683_s27, 4  ;;  %s1731_s11 = scalar_lea.hbm %s1839_s3, %s897_s10  ;;  %s1733_s13 = int_to_ptr.vmem [resolvable:$true] %s720_s13 }
  0x76   : > { %v1079_v5 = vpack.c.bf16 %v302_v4, %v301_v2  ;;  %v304_v7 = vld [vmem:[#allocation5 + $0x28] sm:$0xff]  ;;  %v283_v8 = vld [vmem:[%s1640_s9] sm:$0xff]  ;;  %v305_v10 = vld [vmem:[#allocation5 + $0x30] sm:$0xff]  ;;  %s702_s7 = scalar_lea.sflag [#allocation4], %s1634_s28  ;;  %s1299_s30 = scalar_lea.vmem %s1733_s13, 2048 }
  0x77   : > { %1076 = vmatprep.subr.bf16.mxu0 %v1075_v3  ;;  %1108 = vmatprep.subr.bf16.mxu1 %v1075_v3  ;;  %v1083_v9 = vpack.c.bf16 %v304_v7, %v303_v6  ;;  %v306_v11 = vld [vmem:[#allocation5 + $0x38] sm:$0xff]  ;;  %v307_v13 = vld [vmem:[#allocation5 + $0x40] sm:$0xff]  ;;  %v308_v14 = vld [vmem:[#allocation5 + $0x48] sm:$0xff]  ;;  %p1300_p6 = scmp.ne.s32.totalorder %s1733_s13, %s1299_s30  ;;  %p1857_p1 = scmp.ne.s32.totalorder %s1847_s25, 0 }
  0x78   : > { %1078 = vmatpush3.bf16.xpose.msra.mxu0 %v1075_v3  ;;  %1110 = vmatpush3.bf16.msra.mxu1 %v1075_v3  ;;  %v1087_v12 = vpack.c.bf16 %v306_v11, %v305_v10  ;;  %v1091_v15 = vpack.c.bf16 %v308_v14, %v307_v13  ;;  %v309_v16 = vld [vmem:[#allocation5 + $0x50] sm:$0xff]  ;;  %v310_v17 = vld [vmem:[#allocation5 + $0x58] sm:$0xff]  ;;  %v311_v19 = vld [vmem:[#allocation5 + $0x60] sm:$0xff]  ;;  %s1413_s12 = smov [#allocation8]  }
  0x79   : > { %1080 = vmatprep.subr.bf16.mxu0 %v1079_v5  ;;  %1112 = vmatprep.subr.bf16.mxu1 %v1079_v5  ;;  %v1095_v18 = vpack.c.bf16 %v310_v17, %v309_v16  ;;  %v312_v20 = vld [vmem:[#allocation5 + $0x68] sm:$0xff]  ;;  %v313_v22 = vld [vmem:[#allocation5 + $0x70] sm:$0xff]  ;;  %v314_v23 = vld [vmem:[#allocation5 + $0x78] sm:$0xff]  ;;  %p1301_p11 = pnand %p1300_p6, %p1857_p1  ;;  %s1303_s14 = sshll.u32 %s1413_s12, 4  ;;  %s1304_s14 = int_to_ptr.vmem [resolvable:$false] %s1303_s14 }
  0x7a   : > { %995 = vmatprep.mubr.f32.mxu0 %v283_v8  ;;  %v1099_v21 = vpack.c.bf16 %v312_v20, %v311_v19  ;;  %v1103_v24 = vpack.c.bf16 %v314_v23, %v313_v22  ;;  %v284_v25 = vld [vmem:[%s1640_s9 + $0x8] sm:$0xff]  ;;  %v285_v26 = vld [vmem:[%s1640_s9 + $0x10] sm:$0xff]  ;;  %v286_v27 = vld [vmem:[%s1640_s9 + $0x18] sm:$0xff]  ;;  %s1305_s26 = scalar_lea.vmem %s1304_s14, 4096  ;;  %p1306_p4 = scmp.lt.s32.totalorder %s1733_s13, %s1304_s14 }
  0x7b   : > { %v287_v28 = vld [vmem:[%s1640_s9 + $0x20] sm:$0xff]  ;;  %v288_v29 = vld [vmem:[%s1640_s9 + $0x28] sm:$0xff]  ;;  %v289_v30 = vld [vmem:[%s1640_s9 + $0x30] sm:$0xff]  ;;  %p1302_p13 = pneg %p1301_p11  ;;  %p1307_p2 = scmp.lt.s32.totalorder %s1305_s26, %s1299_s30 }
  0x7c   : > { %1114 = vmatpush3.bf16.msra.mxu1 %v1079_v5  ;;  %v290_v31 = vld [vmem:[%s1640_s9 + $0x38] sm:$0xff]  ;;  %v291_v32 = vld [vmem:[%s1640_s9 + $0x40] sm:$0xff]  ;;  %v292_v33 = vld [vmem:[%s1640_s9 + $0x48] sm:$0xff] }
  0x7d   : > { %1116 = vmatprep.subr.bf16.mxu1 %v1083_v9  ;;  %v293_v34 = vld [vmem:[%s1640_s9 + $0x50] sm:$0xff]  ;;  %v294_v35 = vld [vmem:[%s1640_s9 + $0x58] sm:$0xff]  ;;  %v295_v36 = vld [vmem:[%s1640_s9 + $0x60] sm:$0xff]  ;;  %p1308_p5 = por %p1307_p2, %p1306_p4 }
  0x7e   : > { %v296_v37 = vld [vmem:[%s1640_s9 + $0x68] sm:$0xff]  ;;  %v297_v38 = vld [vmem:[%s1640_s9 + $0x70] sm:$0xff]  ;;  %v298_v39 = vld [vmem:[%s1640_s9 + $0x78] sm:$0xff] }
  0x7f   : > { %v461_v40 = vld [vmem:[%s1651_s24 + $0x8] sm:$0xff]  ;;  %v460_v41 = vld [vmem:[%s1651_s24] sm:$0xff]  ;;  %v463_v42 = vld [vmem:[%s1651_s24 + $0x18] sm:$0xff]  ;;  %p1309_p10 = pnand %p1308_p5, %p1302_p13 }
  0x80   : > { %1082 = vmatpush3.bf16.xpose.msra.mxu0 %v1079_v5  ;;  %1118 = vmatpush3.bf16.msra.mxu1 %v1083_v9  ;;  %vm477_vm0 = vcmp.ge.f32.partialorder %v461_v40, 0.4  ;;  %vm476_vm1 = vcmp.ge.f32.partialorder %v460_v41, 0.4  ;;  %v462_v43 = vld [vmem:[%s1651_s24 + $0x10] sm:$0xff]  ;;  %v465_v48 = vld [vmem:[%s1651_s24 + $0x28] sm:$0xff] }
  0x81   : > { %1084 = vmatprep.subr.bf16.mxu0 %v1083_v9  ;;  %1120 = vmatprep.subr.bf16.mxu1 %v1087_v12  ;;  %v493_v45 = vsel %vm477_vm0, 1.6666666, %v1412_v44  ;;  %v492_v46 = vsel %vm476_vm1, 1.6666666, %v1412_v44  ;;  %vm479_vm2 = vcmp.ge.f32.partialorder %v463_v42, 0.4 }
  0x82   : > { %vm478_vm3 = vcmp.ge.f32.partialorder %v462_v43, 0.4  ;;  %v464_v51 = vld [vmem:[%s1651_s24 + $0x20] sm:$0xff]  ;;  %v495_v53 = vsel %vm479_vm2, 1.6666666, %v1412_v44  ;;  %v467_v56 = vld [vmem:[%s1651_s24 + $0x38] sm:$0xff] }
  0x83   : > { %v494_v54 = vsel %vm478_vm3, 1.6666666, %v1412_v44  ;;  %vm481_vm4 = vcmp.ge.f32.partialorder %v465_v48, 0.4  ;;  %vm480_vm5 = vcmp.ge.f32.partialorder %v464_v51, 0.4 }
  0x84   : > { %1122 = vmatpush3.bf16.msra.mxu1 %v1087_v12  ;;  %v466_v59 = vld [vmem:[%s1651_s24 + $0x30] sm:$0xff]  ;;  %v497_v61 = vsel %vm481_vm4, 1.6666666, %v1412_v44  ;;  %v496_v62 = vsel %vm480_vm5, 1.6666666, %v1412_v44  ;;  %v469_v0 = vld [vmem:[%s1651_s24 + $0x48] sm:$0xff] }
  0x85   : > { %1124 = vmatprep.subr.bf16.mxu1 %v1091_v15  ;;  %vm483_vm6 = vcmp.ge.f32.partialorder %v467_v56, 0.4  ;;  %vm482_vm7 = vcmp.ge.f32.partialorder %v466_v59, 0.4  ;;  %v468_v3 = vld [vmem:[%s1651_s24 + $0x40] sm:$0xff]  ;;  %v471_v8 = vld [vmem:[%s1651_s24 + $0x58] sm:$0xff] }
  0x86   : > { %v499_v5 = vsel %vm483_vm6, 1.6666666, %v1412_v44  ;;  %v498_v6 = vsel %vm482_vm7, 1.6666666, %v1412_v44  ;;  %vm485_vm8 = vcmp.ge.f32.partialorder %v469_v0, 0.4 }
  0x87   : > { %vm484_vm9 = vcmp.ge.f32.partialorder %v468_v3, 0.4  ;;  %v470_v11 = vld [vmem:[%s1651_s24 + $0x50] sm:$0xff]  ;;  %v501_v13 = vsel %vm485_vm8, 1.6666666, %v1412_v44  ;;  %v473_v16 = vld [vmem:[%s1651_s24 + $0x68] sm:$0xff] }
  0x88   : > { %1086 = vmatpush3.bf16.xpose.msra.mxu0 %v1083_v9  ;;  %1126 = vmatpush3.bf16.msra.mxu1 %v1091_v15  ;;  %v500_v14 = vsel %vm484_vm9, 1.6666666, %v1412_v44  ;;  %vm487_vm10 = vcmp.ge.f32.partialorder %v471_v8, 0.4  ;;  %vm486_vm11 = vcmp.ge.f32.partialorder %v470_v11, 0.4 }
  0x89   : > { %1088 = vmatprep.subr.bf16.mxu0 %v1087_v12  ;;  %1128 = vmatprep.subr.bf16.mxu1 %v1095_v18  ;;  %v472_v19 = vld [vmem:[%s1651_s24 + $0x60] sm:$0xff]  ;;  %v502_v22 = vsel %vm486_vm11, 1.6666666, %v1412_v44  ;;  %vm489_vm12 = vcmp.ge.f32.partialorder %v473_v16, 0.4 }
  0x8a   : > { %vm488_vm13 = vcmp.ge.f32.partialorder %v472_v19, 0.4 }
  0x8c   : > { %1130 = vmatpush3.bf16.msra.mxu1 %v1095_v18 }
  0x8d   : > { %1132 = vmatprep.subr.bf16.mxu1 %v1099_v21 }
  0x90   : > { %1090 = vmatpush3.bf16.xpose.msra.mxu0 %v1087_v12  ;;  %1134 = vmatpush3.bf16.msra.mxu1 %v1099_v21 }
  0x91   : > { %1092 = vmatprep.subr.bf16.mxu0 %v1091_v15  ;;  %1136 = vmatprep.subr.bf16.mxu1 %v1103_v24 }
  0x94   : > { %1138 = vmatpush3.bf16.msra.mxu1 %v1103_v24 }
  0x98   : > { %1094 = vmatpush3.bf16.xpose.msra.mxu0 %v1091_v15 }
  0x99   : > { %1096 = vmatprep.subr.bf16.mxu0 %v1095_v18 }
  0xa0   : > { %1098 = vmatpush3.bf16.xpose.msra.mxu0 %v1095_v18 }
  0xa1   : > { %1100 = vmatprep.subr.bf16.mxu0 %v1099_v21 }
  0xa8   : > { %1102 = vmatpush3.bf16.xpose.msra.mxu0 %v1099_v21  ;;  %v503_v21 = vsel %vm487_vm10, 1.6666666, %v1412_v44 }
  0xa9   : > { %1104 = vmatprep.subr.bf16.mxu0 %v1103_v24 }
  0xb0   : > { %1106 = vmatpush3.bf16.xpose.msra.mxu0 %v1103_v24  ;;  %v475_v24 = vld [vmem:[%s1651_s24 + $0x78] sm:$0xff] }
  0xb1   : > { %vm491_vm14 = vcmp.ge.f32.partialorder %v475_v24, 0.4 }
  0xb7   : > { %996 = vmatmul.mubr.f32.vlgmr.msra.gmra.mrb[0].mxu0 %v284_v25 }
  0xb8   : > { %998 = vmatprep.mubr.f32.mxu0 %v285_v26 }
  0xbb   : > { %999 = vmatmul.mubr.f32.gmra.mrb[2].mxu0 %v286_v27  ;;  %v474_v27 = vld [vmem:[%s1651_s24 + $0x70] sm:$0xff] }
  0xbc   : > { %1001 = vmatprep.mubr.f32.mxu0 %v287_v28  ;;  %vm490_vm15 = vcmp.ge.f32.partialorder %v474_v27, 0.4 }
  0xbf   : > { %1002 = vmatmul.mubr.f32.gmra.mrb[4].mxu0 %v288_v29  ;;  %v505_v29 = vsel %vm489_vm12, 1.6666666, %v1412_v44 }
  0xc0   : > { %1004 = vmatprep.mubr.f32.mxu0 %v289_v30  ;;  %v504_v30 = vsel %vm488_vm13, 1.6666666, %v1412_v44 }
  0xc3   : > { %1005 = vmatmul.mubr.f32.gmra.mrb[6].mxu0 %v290_v31 }
  0xc4   : > { %1007 = vmatprep.mubr.f32.mxu0 %v291_v32 }
  0xc7   : > { %1008 = vmatmul.mubr.f32.gmra.mrb[8].mxu0 %v292_v33 }
  0xc8   : > { %1010 = vmatprep.mubr.f32.mxu0 %v293_v34 }
  0xcb   : > { %1011 = vmatmul.mubr.f32.gmra.mrb[10].mxu0 %v294_v35  ;;  %v507_v35 = vsel %vm491_vm14, 1.6666666, %v1412_v44 }
  0xcc   : > { %1013 = vmatprep.mubr.f32.mxu0 %v295_v36  ;;  %v506_v36 = vsel %vm490_vm15, 1.6666666, %v1412_v44 }
  0xcf   : > { %1014 = vmatmul.mubr.f32.gmra.mrb[12].mxu0 %v296_v37 }
  0xd0   : > { %1016 = vmatprep.mubr.f32.mxu0 %v297_v38 }
  0xd3   : > { %1017 = vmatmul.mubr.f32.gmra.mrb[14].mxu0 %v298_v39 }
 0x18a   : > { %v997_v47 = vpop.f32.mrb[0].mxu0 }
 0x18b   : > { %v509_v49 = vmul.f32 %v997_v47, %v493_v45  ;;  %v381_v50 = vpop.f32.mrb[1].mxu0 }
 0x18c   : > { %v508_v52 = vmul.f32 %v492_v46, %v381_v50 }
 0x18d   : > { %525 = vst [vmem:[%s1683_s27 + $0x8] sm:$0xff] %v509_v49 }
 0x18e   : > { %524 = vst [vmem:[%s1683_s27] sm:$0xff] %v508_v52  ;;  %v1000_v55 = vpop.f32.mrb[2].mxu0  ;;  %1051 = vmatprep.mubr.f32.mxu1 %v508_v52 }
 0x18f   : > { %v511_v57 = vmul.f32 %v1000_v55, %v495_v53  ;;  %v391_v58 = vpop.f32.mrb[3].mxu0  ;;  %1052 = vmatmul.mubr.f32.vlgmr.msra.gmra.mrb[0].mxu1 %v509_v49 }
 0x190   : > { %v510_v60 = vmul.f32 %v494_v54, %v391_v58 }
 0x191   : > { %527 = vst [vmem:[%s1683_s27 + $0x18] sm:$0xff] %v511_v57 }
 0x192   : > { %526 = vst [vmem:[%s1683_s27 + $0x10] sm:$0xff] %v510_v60  ;;  %v1003_v63 = vpop.f32.mrb[4].mxu0  ;;  %1054 = vmatprep.mubr.f32.mxu1 %v510_v60 }
 0x193   : > { %v513_v1 = vmul.f32 %v1003_v63, %v497_v61  ;;  %v401_v2 = vpop.f32.mrb[5].mxu0  ;;  %1055 = vmatmul.mubr.f32.gmra.mrb[2].mxu1 %v511_v57 }
 0x194   : > { %v512_v4 = vmul.f32 %v496_v62, %v401_v2 }
 0x195   : > { %529 = vst [vmem:[%s1683_s27 + $0x28] sm:$0xff] %v513_v1 }
 0x196   : > { %528 = vst [vmem:[%s1683_s27 + $0x20] sm:$0xff] %v512_v4  ;;  %v1006_v7 = vpop.f32.mrb[6].mxu0  ;;  %1057 = vmatprep.mubr.f32.mxu1 %v512_v4 }
 0x197   : > { %v515_v9 = vmul.f32 %v1006_v7, %v499_v5  ;;  %v411_v10 = vpop.f32.mrb[7].mxu0  ;;  %1058 = vmatmul.mubr.f32.gmra.mrb[4].mxu1 %v513_v1 }
 0x198   : > { %v514_v12 = vmul.f32 %v498_v6, %v411_v10 }
 0x199   : > { %531 = vst [vmem:[%s1683_s27 + $0x38] sm:$0xff] %v515_v9 }
 0x19a   : > { %530 = vst [vmem:[%s1683_s27 + $0x30] sm:$0xff] %v514_v12  ;;  %v1009_v15 = vpop.f32.mrb[8].mxu0  ;;  %1060 = vmatprep.mubr.f32.mxu1 %v514_v12 }
 0x19b   : > { %v517_v17 = vmul.f32 %v1009_v15, %v501_v13  ;;  %v421_v18 = vpop.f32.mrb[9].mxu0  ;;  %1061 = vmatmul.mubr.f32.gmra.mrb[6].mxu1 %v515_v9 }
 0x19c   : > { %v516_v20 = vmul.f32 %v500_v14, %v421_v18 }
 0x19d   : > { %533 = vst [vmem:[%s1683_s27 + $0x48] sm:$0xff] %v517_v17 }
 0x19e   : > { %532 = vst [vmem:[%s1683_s27 + $0x40] sm:$0xff] %v516_v20  ;;  %v1012_v23 = vpop.f32.mrb[10].mxu0  ;;  %1063 = vmatprep.mubr.f32.mxu1 %v516_v20 }
 0x19f   : > { %v519_v25 = vmul.f32 %v1012_v23, %v503_v21  ;;  %v431_v26 = vpop.f32.mrb[11].mxu0  ;;  %1064 = vmatmul.mubr.f32.gmra.mrb[8].mxu1 %v517_v17 }
 0x1a0   : > { %v518_v28 = vmul.f32 %v502_v22, %v431_v26 }
 0x1a1   : > { %535 = vst [vmem:[%s1683_s27 + $0x58] sm:$0xff] %v519_v25 }
 0x1a2   : > { %534 = vst [vmem:[%s1683_s27 + $0x50] sm:$0xff] %v518_v28  ;;  %v1015_v31 = vpop.f32.mrb[12].mxu0  ;;  %1066 = vmatprep.mubr.f32.mxu1 %v518_v28 }
 0x1a3   : > { %v521_v32 = vmul.f32 %v1015_v31, %v505_v29  ;;  %v441_v33 = vpop.f32.mrb[13].mxu0  ;;  %1067 = vmatmul.mubr.f32.gmra.mrb[10].mxu1 %v519_v25 }
 0x1a4   : > { %v520_v34 = vmul.f32 %v504_v30, %v441_v33 }
 0x1a5   : > { %537 = vst [vmem:[%s1683_s27 + $0x68] sm:$0xff] %v521_v32 }
 0x1a6   : > { %536 = vst [vmem:[%s1683_s27 + $0x60] sm:$0xff] %v520_v34  ;;  %v1018_v37 = vpop.f32.mrb[14].mxu0  ;;  %1069 = vmatprep.mubr.f32.mxu1 %v520_v34 }
 0x1a7   : > { %v523_v38 = vmul.f32 %v1018_v37, %v507_v35  ;;  %v451_v39 = vpop.f32.mrb[15].mxu0  ;;  %1070 = vmatmul.mubr.f32.gmra.mrb[12].mxu1 %v521_v32 }
 0x1a8   : > { %v522_v40 = vmul.f32 %v506_v36, %v451_v39 }
 0x1a9   : > { %539 = vst [vmem:[%s1683_s27 + $0x78] sm:$0xff] %v523_v38 }
 0x1aa   : > { %538 = vst [vmem:[%s1683_s27 + $0x70] sm:$0xff] %v522_v40  ;;  %1072 = vmatprep.mubr.f32.mxu1 %v522_v40 }
 0x1ab   : > { %1073 = vmatmul.mubr.f32.gmra.mrb[14].mxu1 %v523_v38 }
 0x1ac   : > { %1312 = shalt.err (!%p1309_p10)
}
 0x1ad   : > { %s1313_s23 = scalar_lea.hbm %s1731_s11, 2048  ;;  %s1317_s24 = scalar_lea.hbm %s1839_s3, 4096 }
 0x1ae   : > { %p1314_p8 = scmp.ne.s32.totalorder %s1731_s11, %s1313_s23  ;;  %p1318_p0 = scmp.lt.u32.totalorder %s1731_s11, %s1839_s3 }
 0x1af   : > { %p1319_p9 = scmp.lt.u32.totalorder %s1317_s24, %s1313_s23  ;;  %p1321_p6 = scmp.lt.u32.totalorder %s1313_s23, %s1731_s11 }
 0x1b0   : > { %p1315_p7 = pnand %p1314_p8, %p1857_p1 }
 0x1b1   : > { %p1320_p12 = por %p1319_p9, %p1318_p0 }
 0x1b2   : > { %p1316_p3 = pneg %p1315_p7 }
 0x1b3   : > { %p1322_p11 = por %p1321_p6, %p1320_p12 }
 0x1b5   : > { %p1323_p13 = pnand %p1322_p11, %p1316_p3 }
 0x1b7   : > { %1326 = shalt.err (!%p1323_p13)
}
 0x1b8   : > { %s1414_s5 = smov 128   ;;  %s1415_s30 = smov 8  }
 0x1b9   : > { %1147 = dma.vmem_to_hbm [thread:$0]  (%p1857_p1), %s1733_s13, 2048, %s1731_s11, %s702_s7, %s1414_s5, %s1414_s5, %s1415_s30  }
 0x1ba   : > { %s1763_s12 = scalar_lea.vmem [#allocation9], %s1637_s6  ;;  %s1785_s7 = scalar_lea.hbm %s1840_s4, %s897_s10 }
 0x1bb   : > { %s736_s6 = sshll.u32 %s1763_s12, 4  ;;  %s707_s14 = scalar_lea.sflag [#allocation10], %s1634_s28  ;;  %s1787_s6 = int_to_ptr.vmem [resolvable:$true] %s736_s6 }
 0x1bc   : > { %s1327_s26 = scalar_lea.vmem %s1787_s6, 2048  ;;  %s1416_s8 = smov [#allocation9]  }
 0x1bd   : > { %p1328_p4 = scmp.ne.s32.totalorder %s1787_s6, %s1327_s26  ;;  %s1331_s23 = sshll.u32 %s1416_s8, 4  ;;  %s1332_s23 = int_to_ptr.vmem [resolvable:$false] %s1331_s23 }
 0x1be   : > { %s1333_s21 = scalar_lea.vmem %s1332_s23, 4096  ;;  %p1334_p10 = scmp.lt.s32.totalorder %s1787_s6, %s1332_s23 }
 0x1bf   : > { %p1329_p2 = pnand %p1328_p4, %p1857_p1  ;;  %p1335_p8 = scmp.lt.s32.totalorder %s1333_s21, %s1327_s26 }
 0x1c1   : > { %p1330_p5 = pneg %p1329_p2  ;;  %p1336_p7 = por %p1335_p8, %p1334_p10 }
 0x1c3   : > { %p1337_p3 = pnand %p1336_p7, %p1330_p5 }
 0x262   : > { %v1053_v41 = vpop.f32.mrb[0].mxu1 }
 0x263   : > { %686 = vst [vmem:[%s1763_s12 + $0x8] sm:$0xff] %v1053_v41  ;;  %v606_v42 = vpop.f32.mrb[1].mxu1 }
 0x264   : > { %685 = vst [vmem:[%s1763_s12] sm:$0xff] %v606_v42 }
 0x266   : > { %v1056_v43 = vpop.f32.mrb[2].mxu1 }
 0x267   : > { %688 = vst [vmem:[%s1763_s12 + $0x18] sm:$0xff] %v1056_v43  ;;  %v616_v44 = vpop.f32.mrb[3].mxu1 }
 0x268   : > { %687 = vst [vmem:[%s1763_s12 + $0x10] sm:$0xff] %v616_v44 }
 0x26a   : > { %v1059_v45 = vpop.f32.mrb[4].mxu1 }
 0x26b   : > { %690 = vst [vmem:[%s1763_s12 + $0x28] sm:$0xff] %v1059_v45  ;;  %v626_v46 = vpop.f32.mrb[5].mxu1 }
 0x26c   : > { %689 = vst [vmem:[%s1763_s12 + $0x20] sm:$0xff] %v626_v46 }
 0x26e   : > { %v1062_v47 = vpop.f32.mrb[6].mxu1 }
 0x26f   : > { %692 = vst [vmem:[%s1763_s12 + $0x38] sm:$0xff] %v1062_v47  ;;  %v636_v48 = vpop.f32.mrb[7].mxu1 }
 0x270   : > { %691 = vst [vmem:[%s1763_s12 + $0x30] sm:$0xff] %v636_v48 }
 0x272   : > { %v1065_v49 = vpop.f32.mrb[8].mxu1 }
 0x273   : > { %694 = vst [vmem:[%s1763_s12 + $0x48] sm:$0xff] %v1065_v49  ;;  %v646_v50 = vpop.f32.mrb[9].mxu1 }
 0x274   : > { %693 = vst [vmem:[%s1763_s12 + $0x40] sm:$0xff] %v646_v50 }
 0x276   : > { %v1068_v51 = vpop.f32.mrb[10].mxu1 }
 0x277   : > { %696 = vst [vmem:[%s1763_s12 + $0x58] sm:$0xff] %v1068_v51  ;;  %v656_v52 = vpop.f32.mrb[11].mxu1 }
 0x278   : > { %695 = vst [vmem:[%s1763_s12 + $0x50] sm:$0xff] %v656_v52 }
 0x27a   : > { %v1071_v53 = vpop.f32.mrb[12].mxu1 }
 0x27b   : > { %698 = vst [vmem:[%s1763_s12 + $0x68] sm:$0xff] %v1071_v53  ;;  %v666_v54 = vpop.f32.mrb[13].mxu1 }
 0x27c   : > { %697 = vst [vmem:[%s1763_s12 + $0x60] sm:$0xff] %v666_v54 }
 0x27e   : > { %v1074_v55 = vpop.f32.mrb[14].mxu1 }
 0x27f   : > { %700 = vst [vmem:[%s1763_s12 + $0x78] sm:$0xff] %v1074_v55  ;;  %v676_v56 = vpop.f32.mrb[15].mxu1 }
 0x280   : > { %699 = vst [vmem:[%s1763_s12 + $0x70] sm:$0xff] %v676_v56 }
 0x281   : > { %1340 = shalt.err (!%p1337_p3)
}
 0x282   : > { %s1341_s10 = scalar_lea.hbm %s1785_s7, 2048  ;;  %s1345_s27 = scalar_lea.hbm %s1840_s4, 4096 }
 0x283   : > { %p1342_p0 = scmp.ne.s32.totalorder %s1785_s7, %s1341_s10  ;;  %p1346_p6 = scmp.lt.u32.totalorder %s1785_s7, %s1840_s4 }
 0x284   : > { %p1347_p11 = scmp.lt.u32.totalorder %s1345_s27, %s1341_s10  ;;  %p1349_p4 = scmp.lt.u32.totalorder %s1341_s10, %s1785_s7 }
 0x285   : > { %p1343_p9 = pnand %p1342_p0, %p1857_p1 }
 0x286   : > { %p1348_p13 = por %p1347_p11, %p1346_p6 }
 0x287   : > { %p1344_p12 = pneg %p1343_p9 }
 0x288   : > { %p1350_p2 = por %p1349_p4, %p1348_p13 }
 0x28a   : > { %p1351_p5 = pnand %p1350_p2, %p1344_p12 }
 0x28c   : > { %1354 = shalt.err (!%p1351_p5)
}
 0x28d   : > { %1148 = dma.vmem_to_hbm [thread:$0]  (%p1857_p1), %s1787_s6, 2048, %s1785_s7, %s707_s14, %s1414_s5, %s1414_s5, %s1415_s30  }
 0x28e PF: > { %s751_s13 = sand.u32 1, %s1393_s15   ;;  %p1858_p10 = scmp.ne.s32.totalorder %s1848_s29, 0 }
 0x28f   : > { %p1859_p8 = scmp.ge.s32.totalorder %s1405_s18, 2  ;;  %s752_s11 = scalar_lea.sflag [#allocation4], %s751_s13 }
 0x291   : > { %p1163_p7 = pnand %p1859_p8, %p1858_p10 }
 0x293   : > { %1384 = dma.done.wait (!%p1163_p7), %s752_s11, 2048  }
 0x294   : > { %1386 = vsyncadd (!%p1163_p7), %s752_s11, 4294965248  ;;  %s761_s25 = scalar_lea.sflag [#allocation10], %s751_s13 }
 0x295   : > { %1388 = dma.done.wait (!%p1163_p7), %s761_s25, 2048  }
 0x296   : > { %1390 = vsyncadd (!%p1163_p7), %s761_s25, 4294965248  ;;  %p22_p1 = scmp.ge.s32.totalorder %s1463_s19, 4   ;;  %s1860_s15 = smov %s1397_s16 }
 0x297   : > { %s1861_s16 = smov %s1401_s17  ;;  %s1862_s17 = smov %s1472_s22 }
 0x298   : > { %s1863_s18 = smov %s1463_s19  ;;  %24 = sbr.rel (!%p22_p1) target bundleno = 8 (0x8), region = 109 }
 0x29f   :  { %766 = vsyncpa [#allocation3], 1 }
 0x2a0   :  { %768 = vsyncpa [#allocation3 + $0x1], 1 }
 0x2a1   :  { %769 = vsyncpa [#allocation6], 1 }
 0x2a2   :  { %770 = vsyncpa [#allocation4], 1 }
 0x2a3   :  { %772 = vsyncpa [#allocation4 + $0x1], 1 }
 0x2a4   :  { %773 = vsyncpa [#allocation10], 1 }
 0x2a5   :  { %775 = vsyncpa [#allocation10 + $0x1], 1 }

</bundles_post_ra>
